<compile_context>
chip_gen: v6e
topology: v6e:2x2x1
jax: 0.10.0
libtpu: 0.0.40
codegen_flags: <defaults>
</compile_context>

<pallas_src>
import math

import jax
import jax.numpy as jnp
import numpy as np
from jax.experimental import pallas as pl
from jax.experimental.pallas import tpu as pltpu

# ---------------------------------------------------------------------------
# Problem sizes (small, consistent with the module's __init__)
# ---------------------------------------------------------------------------
S = 8            # sequence length
B = 2            # batch
D = 32           # d_model
H = 4            # n_head
RED = 2          # reduction_factor
DH = D // H      # head dim
DHID = D // RED  # mlp hidden
SB = S * B       # tokens
EPS = 1e-5

assert B & (B - 1) == 0, "batch-parity mask below assumes B is a power of two"

# --- packed parameter buffer layout: one (128, 128) f32 slab, single DMA ----
PROWS, PLANES = 128, 128
R_WQKV = 0              # rows [  0,  32) lanes [0, 96) : fused [q*scale | k | v]
R_WO = D                # rows [ 32,  64) lanes [0, 32) : out_proj weight
R_W1 = 2 * D            # rows [ 64,  96) lanes [0, 16) : mlp fc1 weight
R_W2 = 3 * D            # rows [ 96, 112) lanes [0, 32) : mlp fc2 weight
R_VEC = 3 * D + DHID    # rows [112, 120): one packed vector per row
#   +0 ln1_w  +1 ln1_b  +2 ln2_w  +3 ln2_b  +4 bo  +5 b2  +6 bqkv(96)  +7 b1(16)


def _layernorm(x, w, b):
    # LayerNorm computed in float32 (matches the fp16-safe subclass).
    mu = jnp.mean(x, axis=-1, keepdims=True)
    var = jnp.mean(jnp.square(x - mu), axis=-1, keepdims=True)
    return (x - mu) * jax.lax.rsqrt(var + EPS) * w + b


# ---------------------------------------------------------------------------
# Pallas kernel: entire residual block, resident in VMEM, gridless.
# ---------------------------------------------------------------------------
def _block_kernel(x_ref, p_ref, y_ref):
    x = x_ref[...].astype(jnp.float32)                       # (SB, D), rows = (s, b)

    # ---- parameter slices (static; weight row offsets are multiples of 8) ----
    wqkv = p_ref[R_WQKV:R_WQKV + D, 0:3 * D]                 # (D, 3D)
    wo = p_ref[R_WO:R_WO + D, 0:D]                           # (D, D)
    w1 = p_ref[R_W1:R_W1 + D, 0:DHID]                        # (D, DHID)
    w2 = p_ref[R_W2:R_W2 + DHID, 0:D]                        # (DHID, D)
    ln1_w = p_ref[R_VEC + 0:R_VEC + 1, 0:D]
    ln1_b = p_ref[R_VEC + 1:R_VEC + 2, 0:D]
    ln2_w = p_ref[R_VEC + 2:R_VEC + 3, 0:D]
    ln2_b = p_ref[R_VEC + 3:R_VEC + 4, 0:D]
    bo = p_ref[R_VEC + 4:R_VEC + 5, 0:D]
    b2 = p_ref[R_VEC + 5:R_VEC + 6, 0:D]
    bqkv = p_ref[R_VEC + 6:R_VEC + 7, 0:3 * D]
    b1 = p_ref[R_VEC + 7:R_VEC + 8, 0:DHID]

    # ---- ln_1 + fused QKV projection (q scale pre-folded into wqkv/bqkv) ----
    h = _layernorm(x, ln1_w, ln1_b)                          # (SB, D)
    qkv = jnp.dot(h, wqkv, preferred_element_type=jnp.float32) + bqkv   # (SB, 3D)

    # ---- attention over all SB tokens at once, per head ----
    # Rows are (s, b) ordered, so tokens of the same batch share (t % B): mask
    # cross-batch pairs instead of introducing a batch dim / batch loop.
    q = qkv[:, 0:D]                                          # (SB, D), lane offset 0
    kvT = jnp.transpose(qkv[:, D:3 * D])                     # (2D, SB): one 2D transpose
                                                             # -> per-head K/V slices are
                                                             #    free sublane slices.
    ti = jax.lax.broadcasted_iota(jnp.int32, (SB, SB), 0)
    tj = jax.lax.broadcasted_iota(jnp.int32, (SB, SB), 1)
    same_batch = jnp.bitwise_and(ti, B - 1) == jnp.bitwise_and(tj, B - 1)

    attn_proj = jnp.zeros((SB, D), jnp.float32)
    for hh in range(H):
        qh = q[:, hh * DH:(hh + 1) * DH]                     # (SB, DH) narrow lane slice
        kTh = kvT[hh * DH:(hh + 1) * DH, :]                  # (DH, SB) sublane slice
        vTh = kvT[D + hh * DH:D + (hh + 1) * DH, :]          # (DH, SB) sublane slice

        s = jnp.dot(qh, kTh, preferred_element_type=jnp.float32)       # (SB, SB)
        s = jnp.where(same_batch, s, jnp.float32(-1e30))
        s = s - jnp.max(s, axis=-1, keepdims=True)
        p = jnp.exp(s)
        p = p * pl.reciprocal(jnp.sum(p, axis=-1, keepdims=True), approx=True)

        # o_h = softmax @ V_h  (NT matmul against the transposed V slice)
        o = jax.lax.dot_general(p, vTh, (((1,), (1,)), ((), ())),
                                preferred_element_type=jnp.float32)    # (SB, DH)
        # Fold the head concat into out_proj: sublane-aligned row slice of wo.
        attn_proj = attn_proj + jnp.dot(o, wo[hh * DH:(hh + 1) * DH, :],
                                        preferred_element_type=jnp.float32)

    # ---- output projection bias + first residual ----
    x1 = x + attn_proj + bo

    # ---- ln_2 + MLP (Linear -> ReLU -> Linear); dropout == identity (eval) ----
    g = _layernorm(x1, ln2_w, ln2_b)
    m = jnp.dot(g, w1, preferred_element_type=jnp.float32) + b1
    m = jnp.maximum(m, 0.0)
    y = x1 + jnp.dot(m, w2, preferred_element_type=jnp.float32) + b2

    y_ref[...] = y.astype(y_ref.dtype)


# ---------------------------------------------------------------------------
# Parameter packing: fuse QKV, fold q scale, pack EVERYTHING into one buffer.
# ---------------------------------------------------------------------------
def pack_params(p):
    scale = 1.0 / math.sqrt(DH)
    wq = np.asarray(p["wq"], np.float32) * scale
    wk = np.asarray(p["wk"], np.float32)
    wv = np.asarray(p["wv"], np.float32)
    bq = np.asarray(p["bq"], np.float32).ravel() * scale
    bk = np.asarray(p["bk"], np.float32).ravel()
    bv = np.asarray(p["bv"], np.float32).ravel()

    buf = np.zeros((PROWS, PLANES), np.float32)
    buf[R_WQKV:R_WQKV + D, 0:3 * D] = np.concatenate([wq, wk, wv], axis=1)
    buf[R_WO:R_WO + D, 0:D] = np.asarray(p["wo"], np.float32)
    buf[R_W1:R_W1 + D, 0:DHID] = np.asarray(p["w1"], np.float32)
    buf[R_W2:R_W2 + DHID, 0:D] = np.asarray(p["w2"], np.float32)

    buf[R_VEC + 0, 0:D] = np.asarray(p["ln1_w"], np.float32).ravel()
    buf[R_VEC + 1, 0:D] = np.asarray(p["ln1_b"], np.float32).ravel()
    buf[R_VEC + 2, 0:D] = np.asarray(p["ln2_w"], np.float32).ravel()
    buf[R_VEC + 3, 0:D] = np.asarray(p["ln2_b"], np.float32).ravel()
    buf[R_VEC + 4, 0:D] = np.asarray(p["bo"], np.float32).ravel()
    buf[R_VEC + 5, 0:D] = np.asarray(p["b2"], np.float32).ravel()
    buf[R_VEC + 6, 0:3 * D] = np.concatenate([bq, bk, bv])
    buf[R_VEC + 7, 0:DHID] = np.asarray(p["b1"], np.float32).ravel()
    return jnp.asarray(buf)


# ---------------------------------------------------------------------------
# Wrapper: no transposes, only free reshapes around a 2-input pallas_call.
# ---------------------------------------------------------------------------
@jax.jit
def residual_attention_block(x_sbd, params_buf):
    # x_sbd: (S, B, D) -- PyTorch MultiheadAttention convention.
    x2d = x_sbd.reshape(SB, D)                               # free: keeps (s, b) row order
    vmem = pl.BlockSpec(memory_space=pltpu.MemorySpace.VMEM)
    y2d = pl.pallas_call(
        _block_kernel,
        out_shape=jax.ShapeDtypeStruct((SB, D), x_sbd.dtype),
        in_specs=[vmem, vmem],
        out_specs=vmem,
    )(x2d, params_buf)
    return y2d.reshape(S, B, D)


# ---------------------------------------------------------------------------
# Pure-JAX reference (same math) for a correctness check
# ---------------------------------------------------------------------------
def reference_forward(x_sbd, p):
    hp = jax.lax.Precision.HIGHEST
    x = x_sbd.astype(jnp.float32)                            # (S, B, D)

    h = _layernorm(x, p["ln1_w"], p["ln1_b"])
    q = jnp.einsum("sbd,de->sbe", h, p["wq"], precision=hp) + p["bq"]
    k = jnp.einsum("sbd,de->sbe", h, p["wk"], precision=hp) + p["bk"]
    v = jnp.einsum("sbd,de->sbe", h, p["wv"], precision=hp) + p["bv"]
    q = q.reshape(S, B, H, DH) / math.sqrt(DH)
    k = k.reshape(S, B, H, DH)
    v = v.reshape(S, B, H, DH)
    sc = jnp.einsum("sbhd,tbhd->bhst", q, k, precision=hp)
    pmx = jax.nn.softmax(sc, axis=-1)
    o = jnp.einsum("bhst,tbhd->sbhd", pmx, v, precision=hp).reshape(S, B, D)
    o = jnp.einsum("sbd,de->sbe", o, p["wo"], precision=hp) + p["bo"]
    x = x + o

    g = _layernorm(x, p["ln2_w"], p["ln2_b"])
    m = jnp.einsum("sbd,dk->sbk", g, p["w1"], precision=hp) + p["b1"]
    m = jnp.maximum(m, 0.0)
    m = jnp.einsum("sbk,kd->sbd", m, p["w2"], precision=hp) + p["b2"]
    return x + m


# ---------------------------------------------------------------------------
# Deterministic parameter initialization (shapes per nn.MultiheadAttention /
# LayerNorm / Linear in __init__).  Weights are stored pre-transposed so the
# kernel computes x @ W  (PyTorch Linear computes x @ W.T).
# ---------------------------------------------------------------------------
def make_params(key):
    ks = jax.random.split(key, 8)
    sd = 0.05
    params = {
        "ln1_w": jnp.ones((1, D), jnp.float32),
        "ln1_b": jnp.zeros((1, D), jnp.float32),
        "ln2_w": jnp.ones((1, D), jnp.float32),
        "ln2_b": jnp.zeros((1, D), jnp.float32),
        # in_proj_weight (3D, D) split into q/k/v, transposed to (D, D)
        "wq": sd * jax.random.normal(ks[0], (D, D), jnp.float32),
        "wk": sd * jax.random.normal(ks[1], (D, D), jnp.float32),
        "wv": sd * jax.random.normal(ks[2], (D, D), jnp.float32),
        "bq": sd * jax.random.normal(ks[3], (1, D), jnp.float32),
        "bk": sd * jax.random.normal(ks[4], (1, D), jnp.float32),
        "bv": sd * jax.random.normal(ks[5], (1, D), jnp.float32),
        # out_proj (D, D) transposed
        "wo": sd * jax.random.normal(ks[6], (D, D), jnp.float32),
        "bo": sd * jax.random.normal(ks[7], (1, D), jnp.float32),
        # mlp: Linear(D, D//RED) and Linear(D//RED, D), transposed
        "w1": sd * jax.random.normal(jax.random.fold_in(key, 100), (D, DHID), jnp.float32),
        "b1": sd * jax.random.normal(jax.random.fold_in(key, 101), (1, DHID), jnp.float32),
        "w2": sd * jax.random.normal(jax.random.fold_in(key, 102), (DHID, D), jnp.float32),
        "b2": sd * jax.random.normal(jax.random.fold_in(key, 103), (1, D), jnp.float32),
    }
    return params


if __name__ == "__main__":
    key = jax.random.PRNGKey(0)
    kx, kp = jax.random.split(key)

    x = jax.random.normal(kx, (S, B, D), jnp.float32)        # (seq, batch, d_model)
    params = make_params(kp)
    packed = pack_params(params)

    y = residual_attention_block(x, packed)
    y = jax.block_until_ready(y)

    y_ref = reference_forward(x, params)
    np.testing.assert_allclose(np.asarray(y), np.asarray(y_ref), rtol=2e-3, atol=2e-3)

    print("KERNEL_OK")
</pallas_src>

<mosaic_0001>
module attributes {stable_mosaic.version = 11 : i64} {
  func.func @_block_kernel(%arg0: memref<16x32xf32, #tpu.memory_space<vmem>>, %arg1: memref<128x128xf32, #tpu.memory_space<vmem>>, %arg2: memref<16x32xf32, #tpu.memory_space<vmem>>) attributes {dimension_semantics = [], scalar_prefetch = 0 : i64, scratch_operands = 0 : i64, tpu.core_type = #tpu.core_type<tc>} {
    %c0 = arith.constant 0 : index
    %c0_0 = arith.constant 0 : index
    %0 = vector.load %arg0[%c0, %c0_0] : memref<16x32xf32, #tpu.memory_space<vmem>>, vector<16x32xf32>
    %c0_1 = arith.constant 0 : index
    %c0_2 = arith.constant 0 : index
    %1 = vector.load %arg1[%c0_1, %c0_2] : memref<128x128xf32, #tpu.memory_space<vmem>>, vector<32x96xf32>
    %c32 = arith.constant 32 : index
    %c0_3 = arith.constant 0 : index
    %2 = vector.load %arg1[%c32, %c0_3] : memref<128x128xf32, #tpu.memory_space<vmem>>, vector<32x32xf32>
    %c64 = arith.constant 64 : index
    %c0_4 = arith.constant 0 : index
    %3 = vector.load %arg1[%c64, %c0_4] : memref<128x128xf32, #tpu.memory_space<vmem>>, vector<32x16xf32>
    %c96 = arith.constant 96 : index
    %c0_5 = arith.constant 0 : index
    %4 = vector.load %arg1[%c96, %c0_5] : memref<128x128xf32, #tpu.memory_space<vmem>>, vector<16x32xf32>
    %c112 = arith.constant 112 : index
    %c0_6 = arith.constant 0 : index
    %5 = vector.load %arg1[%c112, %c0_6] : memref<128x128xf32, #tpu.memory_space<vmem>>, vector<1x32xf32>
    %c113 = arith.constant 113 : index
    %c0_7 = arith.constant 0 : index
    %6 = vector.load %arg1[%c113, %c0_7] : memref<128x128xf32, #tpu.memory_space<vmem>>, vector<1x32xf32>
    %c114 = arith.constant 114 : index
    %c0_8 = arith.constant 0 : index
    %7 = vector.load %arg1[%c114, %c0_8] : memref<128x128xf32, #tpu.memory_space<vmem>>, vector<1x32xf32>
    %c115 = arith.constant 115 : index
    %c0_9 = arith.constant 0 : index
    %8 = vector.load %arg1[%c115, %c0_9] : memref<128x128xf32, #tpu.memory_space<vmem>>, vector<1x32xf32>
    %c116 = arith.constant 116 : index
    %c0_10 = arith.constant 0 : index
    %9 = vector.load %arg1[%c116, %c0_10] : memref<128x128xf32, #tpu.memory_space<vmem>>, vector<1x32xf32>
    %c117 = arith.constant 117 : index
    %c0_11 = arith.constant 0 : index
    %10 = vector.load %arg1[%c117, %c0_11] : memref<128x128xf32, #tpu.memory_space<vmem>>, vector<1x32xf32>
    %c118 = arith.constant 118 : index
    %c0_12 = arith.constant 0 : index
    %11 = vector.load %arg1[%c118, %c0_12] : memref<128x128xf32, #tpu.memory_space<vmem>>, vector<1x96xf32>
    %c119 = arith.constant 119 : index
    %c0_13 = arith.constant 0 : index
    %12 = vector.load %arg1[%c119, %c0_13] : memref<128x128xf32, #tpu.memory_space<vmem>>, vector<1x16xf32>
    %cst = arith.constant dense<0.000000e+00> : vector<16xf32>
    %13 = vector.multi_reduction <add>, %0, %cst [1] : vector<16x32xf32> to vector<16xf32>
    %14 = vector.shape_cast %13 : vector<16xf32> to vector<16x1xf32>
    %cst_14 = arith.constant 3.200000e+01 : f32
    %15 = vector.broadcast %cst_14 : f32 to vector<16x1xf32>
    %16 = arith.divf %14, %15 : vector<16x1xf32>
    %17 = vector.broadcast %16 : vector<16x1xf32> to vector<16x32xf32>
    %18 = arith.subf %0, %17 : vector<16x32xf32>
    %19 = arith.mulf %18, %18 : vector<16x32xf32>
    %cst_15 = arith.constant dense<0.000000e+00> : vector<16xf32>
    %20 = vector.multi_reduction <add>, %19, %cst_15 [1] : vector<16x32xf32> to vector<16xf32>
    %21 = vector.shape_cast %20 : vector<16xf32> to vector<16x1xf32>
    %cst_16 = arith.constant 3.200000e+01 : f32
    %22 = vector.broadcast %cst_16 : f32 to vector<16x1xf32>
    %23 = arith.divf %21, %22 : vector<16x1xf32>
    %24 = vector.broadcast %16 : vector<16x1xf32> to vector<16x32xf32>
    %25 = arith.subf %0, %24 : vector<16x32xf32>
    %cst_17 = arith.constant 9.99999974E-6 : f32
    %26 = vector.broadcast %cst_17 : f32 to vector<16x1xf32>
    %27 = arith.addf %23, %26 : vector<16x1xf32>
    %28 = math.rsqrt %27 : vector<16x1xf32>
    %29 = vector.broadcast %28 : vector<16x1xf32> to vector<16x32xf32>
    %30 = arith.mulf %25, %29 : vector<16x32xf32>
    %31 = vector.broadcast %5 : vector<1x32xf32> to vector<16x32xf32>
    %32 = arith.mulf %30, %31 : vector<16x32xf32>
    %33 = vector.broadcast %6 : vector<1x32xf32> to vector<16x32xf32>
    %34 = arith.addf %32, %33 : vector<16x32xf32>
    %cst_18 = arith.constant dense<0.000000e+00> : vector<16x96xf32>
    %35 = tpu.matmul %34, %1, %cst_18 {dimension_numbers = #tpu.dot_dimension_numbers<[1], [0], [0], [1], [0, 0, 1, 1], [], []>} : vector<16x32xf32>, vector<32x96xf32>, vector<16x96xf32> -> vector<16x96xf32>
    %36 = vector.broadcast %11 : vector<1x96xf32> to vector<16x96xf32>
    %37 = arith.addf %35, %36 : vector<16x96xf32>
    %38 = vector.extract_strided_slice %37 {offsets = [0, 0], sizes = [16, 32], strides = [1, 1]} : vector<16x96xf32> to vector<16x32xf32>
    %39 = vector.extract_strided_slice %37 {offsets = [0, 32], sizes = [16, 64], strides = [1, 1]} : vector<16x96xf32> to vector<16x64xf32>
    %40 = tpu.transpose %39, [1, 0] : vector<16x64xf32> -> vector<64x16xf32>
    %41 = tpu.iota {dimensions = array<i32: 0>} : vector<16x16xi32>
    %42 = tpu.iota {dimensions = array<i32: 1>} : vector<16x16xi32>
    %c1_i32 = arith.constant 1 : i32
    %43 = vector.broadcast %c1_i32 : i32 to vector<16x16xi32>
    %44 = arith.andi %41, %43 : vector<16x16xi32>
    %c1_i32_19 = arith.constant 1 : i32
    %45 = vector.broadcast %c1_i32_19 : i32 to vector<16x16xi32>
    %46 = arith.andi %42, %45 : vector<16x16xi32>
    %47 = arith.cmpi eq, %44, %46 : vector<16x16xi32>
    %cst_20 = arith.constant 0.000000e+00 : f32
    %48 = vector.broadcast %cst_20 : f32 to vector<16x32xf32>
    %49 = vector.extract_strided_slice %38 {offsets = [0, 0], sizes = [16, 8], strides = [1, 1]} : vector<16x32xf32> to vector<16x8xf32>
    %50 = vector.extract_strided_slice %40 {offsets = [0, 0], sizes = [8, 16], strides = [1, 1]} : vector<64x16xf32> to vector<8x16xf32>
    %51 = vector.extract_strided_slice %40 {offsets = [32, 0], sizes = [8, 16], strides = [1, 1]} : vector<64x16xf32> to vector<8x16xf32>
    %cst_21 = arith.constant dense<0.000000e+00> : vector<16x16xf32>
    %52 = tpu.matmul %49, %50, %cst_21 {dimension_numbers = #tpu.dot_dimension_numbers<[1], [0], [0], [1], [0, 0, 1, 1], [], []>} : vector<16x8xf32>, vector<8x16xf32>, vector<16x16xf32> -> vector<16x16xf32>
    %cst_22 = arith.constant -1.000000e+30 : f32
    %53 = vector.broadcast %cst_22 : f32 to vector<16x16xf32>
    %54 = arith.select %47, %52, %53 : vector<16x16xi1>, vector<16x16xf32>
    %cst_23 = arith.constant dense<0xFF800000> : vector<16xf32>
    %55 = vector.multi_reduction <maximumf>, %54, %cst_23 [1] : vector<16x16xf32> to vector<16xf32>
    %56 = vector.shape_cast %55 : vector<16xf32> to vector<16x1xf32>
    %57 = vector.broadcast %56 : vector<16x1xf32> to vector<16x16xf32>
    %58 = arith.subf %54, %57 : vector<16x16xf32>
    %59 = math.exp %58 : vector<16x16xf32>
    %cst_24 = arith.constant dense<0.000000e+00> : vector<16xf32>
    %60 = vector.multi_reduction <add>, %59, %cst_24 [1] : vector<16x16xf32> to vector<16xf32>
    %61 = vector.shape_cast %60 : vector<16xf32> to vector<16x1xf32>
    %62 = tpu.reciprocal %61 {approx = true} : vector<16x1xf32> -> vector<16x1xf32>
    %63 = vector.broadcast %62 : vector<16x1xf32> to vector<16x16xf32>
    %64 = arith.mulf %59, %63 : vector<16x16xf32>
    %cst_25 = arith.constant dense<0.000000e+00> : vector<16x8xf32>
    %65 = tpu.matmul %64, %51, %cst_25 {dimension_numbers = #tpu.dot_dimension_numbers<[1], [1], [0], [0], [0, 0, 1, 0], [], []>} : vector<16x16xf32>, vector<8x16xf32>, vector<16x8xf32> -> vector<16x8xf32>
    %66 = vector.extract_strided_slice %2 {offsets = [0, 0], sizes = [8, 32], strides = [1, 1]} : vector<32x32xf32> to vector<8x32xf32>
    %cst_26 = arith.constant dense<0.000000e+00> : vector<16x32xf32>
    %67 = tpu.matmul %65, %66, %cst_26 {dimension_numbers = #tpu.dot_dimension_numbers<[1], [0], [0], [1], [0, 0, 1, 1], [], []>} : vector<16x8xf32>, vector<8x32xf32>, vector<16x32xf32> -> vector<16x32xf32>
    %68 = arith.addf %48, %67 : vector<16x32xf32>
    %69 = vector.extract_strided_slice %38 {offsets = [0, 8], sizes = [16, 8], strides = [1, 1]} : vector<16x32xf32> to vector<16x8xf32>
    %70 = vector.extract_strided_slice %40 {offsets = [8, 0], sizes = [8, 16], strides = [1, 1]} : vector<64x16xf32> to vector<8x16xf32>
    %71 = vector.extract_strided_slice %40 {offsets = [40, 0], sizes = [8, 16], strides = [1, 1]} : vector<64x16xf32> to vector<8x16xf32>
    %cst_27 = arith.constant dense<0.000000e+00> : vector<16x16xf32>
    %72 = tpu.matmul %69, %70, %cst_27 {dimension_numbers = #tpu.dot_dimension_numbers<[1], [0], [0], [1], [0, 0, 1, 1], [], []>} : vector<16x8xf32>, vector<8x16xf32>, vector<16x16xf32> -> vector<16x16xf32>
    %cst_28 = arith.constant -1.000000e+30 : f32
    %73 = vector.broadcast %cst_28 : f32 to vector<16x16xf32>
    %74 = arith.select %47, %72, %73 : vector<16x16xi1>, vector<16x16xf32>
    %cst_29 = arith.constant dense<0xFF800000> : vector<16xf32>
    %75 = vector.multi_reduction <maximumf>, %74, %cst_29 [1] : vector<16x16xf32> to vector<16xf32>
    %76 = vector.shape_cast %75 : vector<16xf32> to vector<16x1xf32>
    %77 = vector.broadcast %76 : vector<16x1xf32> to vector<16x16xf32>
    %78 = arith.subf %74, %77 : vector<16x16xf32>
    %79 = math.exp %78 : vector<16x16xf32>
    %cst_30 = arith.constant dense<0.000000e+00> : vector<16xf32>
    %80 = vector.multi_reduction <add>, %79, %cst_30 [1] : vector<16x16xf32> to vector<16xf32>
    %81 = vector.shape_cast %80 : vector<16xf32> to vector<16x1xf32>
    %82 = tpu.reciprocal %81 {approx = true} : vector<16x1xf32> -> vector<16x1xf32>
    %83 = vector.broadcast %82 : vector<16x1xf32> to vector<16x16xf32>
    %84 = arith.mulf %79, %83 : vector<16x16xf32>
    %cst_31 = arith.constant dense<0.000000e+00> : vector<16x8xf32>
    %85 = tpu.matmul %84, %71, %cst_31 {dimension_numbers = #tpu.dot_dimension_numbers<[1], [1], [0], [0], [0, 0, 1, 0], [], []>} : vector<16x16xf32>, vector<8x16xf32>, vector<16x8xf32> -> vector<16x8xf32>
    %86 = vector.extract_strided_slice %2 {offsets = [8, 0], sizes = [8, 32], strides = [1, 1]} : vector<32x32xf32> to vector<8x32xf32>
    %cst_32 = arith.constant dense<0.000000e+00> : vector<16x32xf32>
    %87 = tpu.matmul %85, %86, %cst_32 {dimension_numbers = #tpu.dot_dimension_numbers<[1], [0], [0], [1], [0, 0, 1, 1], [], []>} : vector<16x8xf32>, vector<8x32xf32>, vector<16x32xf32> -> vector<16x32xf32>
    %88 = arith.addf %68, %87 : vector<16x32xf32>
    %89 = vector.extract_strided_slice %38 {offsets = [0, 16], sizes = [16, 8], strides = [1, 1]} : vector<16x32xf32> to vector<16x8xf32>
    %90 = vector.extract_strided_slice %40 {offsets = [16, 0], sizes = [8, 16], strides = [1, 1]} : vector<64x16xf32> to vector<8x16xf32>
    %91 = vector.extract_strided_slice %40 {offsets = [48, 0], sizes = [8, 16], strides = [1, 1]} : vector<64x16xf32> to vector<8x16xf32>
    %cst_33 = arith.constant dense<0.000000e+00> : vector<16x16xf32>
    %92 = tpu.matmul %89, %90, %cst_33 {dimension_numbers = #tpu.dot_dimension_numbers<[1], [0], [0], [1], [0, 0, 1, 1], [], []>} : vector<16x8xf32>, vector<8x16xf32>, vector<16x16xf32> -> vector<16x16xf32>
    %cst_34 = arith.constant -1.000000e+30 : f32
    %93 = vector.broadcast %cst_34 : f32 to vector<16x16xf32>
    %94 = arith.select %47, %92, %93 : vector<16x16xi1>, vector<16x16xf32>
    %cst_35 = arith.constant dense<0xFF800000> : vector<16xf32>
    %95 = vector.multi_reduction <maximumf>, %94, %cst_35 [1] : vector<16x16xf32> to vector<16xf32>
    %96 = vector.shape_cast %95 : vector<16xf32> to vector<16x1xf32>
    %97 = vector.broadcast %96 : vector<16x1xf32> to vector<16x16xf32>
    %98 = arith.subf %94, %97 : vector<16x16xf32>
    %99 = math.exp %98 : vector<16x16xf32>
    %cst_36 = arith.constant dense<0.000000e+00> : vector<16xf32>
    %100 = vector.multi_reduction <add>, %99, %cst_36 [1] : vector<16x16xf32> to vector<16xf32>
    %101 = vector.shape_cast %100 : vector<16xf32> to vector<16x1xf32>
    %102 = tpu.reciprocal %101 {approx = true} : vector<16x1xf32> -> vector<16x1xf32>
    %103 = vector.broadcast %102 : vector<16x1xf32> to vector<16x16xf32>
    %104 = arith.mulf %99, %103 : vector<16x16xf32>
    %cst_37 = arith.constant dense<0.000000e+00> : vector<16x8xf32>
    %105 = tpu.matmul %104, %91, %cst_37 {dimension_numbers = #tpu.dot_dimension_numbers<[1], [1], [0], [0], [0, 0, 1, 0], [], []>} : vector<16x16xf32>, vector<8x16xf32>, vector<16x8xf32> -> vector<16x8xf32>
    %106 = vector.extract_strided_slice %2 {offsets = [16, 0], sizes = [8, 32], strides = [1, 1]} : vector<32x32xf32> to vector<8x32xf32>
    %cst_38 = arith.constant dense<0.000000e+00> : vector<16x32xf32>
    %107 = tpu.matmul %105, %106, %cst_38 {dimension_numbers = #tpu.dot_dimension_numbers<[1], [0], [0], [1], [0, 0, 1, 1], [], []>} : vector<16x8xf32>, vector<8x32xf32>, vector<16x32xf32> -> vector<16x32xf32>
    %108 = arith.addf %88, %107 : vector<16x32xf32>
    %109 = vector.extract_strided_slice %38 {offsets = [0, 24], sizes = [16, 8], strides = [1, 1]} : vector<16x32xf32> to vector<16x8xf32>
    %110 = vector.extract_strided_slice %40 {offsets = [24, 0], sizes = [8, 16], strides = [1, 1]} : vector<64x16xf32> to vector<8x16xf32>
    %111 = vector.extract_strided_slice %40 {offsets = [56, 0], sizes = [8, 16], strides = [1, 1]} : vector<64x16xf32> to vector<8x16xf32>
    %cst_39 = arith.constant dense<0.000000e+00> : vector<16x16xf32>
    %112 = tpu.matmul %109, %110, %cst_39 {dimension_numbers = #tpu.dot_dimension_numbers<[1], [0], [0], [1], [0, 0, 1, 1], [], []>} : vector<16x8xf32>, vector<8x16xf32>, vector<16x16xf32> -> vector<16x16xf32>
    %cst_40 = arith.constant -1.000000e+30 : f32
    %113 = vector.broadcast %cst_40 : f32 to vector<16x16xf32>
    %114 = arith.select %47, %112, %113 : vector<16x16xi1>, vector<16x16xf32>
    %cst_41 = arith.constant dense<0xFF800000> : vector<16xf32>
    %115 = vector.multi_reduction <maximumf>, %114, %cst_41 [1] : vector<16x16xf32> to vector<16xf32>
    %116 = vector.shape_cast %115 : vector<16xf32> to vector<16x1xf32>
    %117 = vector.broadcast %116 : vector<16x1xf32> to vector<16x16xf32>
    %118 = arith.subf %114, %117 : vector<16x16xf32>
    %119 = math.exp %118 : vector<16x16xf32>
    %cst_42 = arith.constant dense<0.000000e+00> : vector<16xf32>
    %120 = vector.multi_reduction <add>, %119, %cst_42 [1] : vector<16x16xf32> to vector<16xf32>
    %121 = vector.shape_cast %120 : vector<16xf32> to vector<16x1xf32>
    %122 = tpu.reciprocal %121 {approx = true} : vector<16x1xf32> -> vector<16x1xf32>
    %123 = vector.broadcast %122 : vector<16x1xf32> to vector<16x16xf32>
    %124 = arith.mulf %119, %123 : vector<16x16xf32>
    %cst_43 = arith.constant dense<0.000000e+00> : vector<16x8xf32>
    %125 = tpu.matmul %124, %111, %cst_43 {dimension_numbers = #tpu.dot_dimension_numbers<[1], [1], [0], [0], [0, 0, 1, 0], [], []>} : vector<16x16xf32>, vector<8x16xf32>, vector<16x8xf32> -> vector<16x8xf32>
    %126 = vector.extract_strided_slice %2 {offsets = [24, 0], sizes = [8, 32], strides = [1, 1]} : vector<32x32xf32> to vector<8x32xf32>
    %cst_44 = arith.constant dense<0.000000e+00> : vector<16x32xf32>
    %127 = tpu.matmul %125, %126, %cst_44 {dimension_numbers = #tpu.dot_dimension_numbers<[1], [0], [0], [1], [0, 0, 1, 1], [], []>} : vector<16x8xf32>, vector<8x32xf32>, vector<16x32xf32> -> vector<16x32xf32>
    %128 = arith.addf %108, %127 : vector<16x32xf32>
    %129 = arith.addf %0, %128 : vector<16x32xf32>
    %130 = vector.broadcast %9 : vector<1x32xf32> to vector<16x32xf32>
    %131 = arith.addf %129, %130 : vector<16x32xf32>
    %cst_45 = arith.constant dense<0.000000e+00> : vector<16xf32>
    %132 = vector.multi_reduction <add>, %131, %cst_45 [1] : vector<16x32xf32> to vector<16xf32>
    %133 = vector.shape_cast %132 : vector<16xf32> to vector<16x1xf32>
    %cst_46 = arith.constant 3.200000e+01 : f32
    %134 = vector.broadcast %cst_46 : f32 to vector<16x1xf32>
    %135 = arith.divf %133, %134 : vector<16x1xf32>
    %136 = vector.broadcast %135 : vector<16x1xf32> to vector<16x32xf32>
    %137 = arith.subf %131, %136 : vector<16x32xf32>
    %138 = arith.mulf %137, %137 : vector<16x32xf32>
    %cst_47 = arith.constant dense<0.000000e+00> : vector<16xf32>
    %139 = vector.multi_reduction <add>, %138, %cst_47 [1] : vector<16x32xf32> to vector<16xf32>
    %140 = vector.shape_cast %139 : vector<16xf32> to vector<16x1xf32>
    %cst_48 = arith.constant 3.200000e+01 : f32
    %141 = vector.broadcast %cst_48 : f32 to vector<16x1xf32>
    %142 = arith.divf %140, %141 : vector<16x1xf32>
    %143 = vector.broadcast %135 : vector<16x1xf32> to vector<16x32xf32>
    %144 = arith.subf %131, %143 : vector<16x32xf32>
    %cst_49 = arith.constant 9.99999974E-6 : f32
    %145 = vector.broadcast %cst_49 : f32 to vector<16x1xf32>
    %146 = arith.addf %142, %145 : vector<16x1xf32>
    %147 = math.rsqrt %146 : vector<16x1xf32>
    %148 = vector.broadcast %147 : vector<16x1xf32> to vector<16x32xf32>
    %149 = arith.mulf %144, %148 : vector<16x32xf32>
    %150 = vector.broadcast %7 : vector<1x32xf32> to vector<16x32xf32>
    %151 = arith.mulf %149, %150 : vector<16x32xf32>
    %152 = vector.broadcast %8 : vector<1x32xf32> to vector<16x32xf32>
    %153 = arith.addf %151, %152 : vector<16x32xf32>
    %cst_50 = arith.constant dense<0.000000e+00> : vector<16x16xf32>
    %154 = tpu.matmul %153, %3, %cst_50 {dimension_numbers = #tpu.dot_dimension_numbers<[1], [0], [0], [1], [0, 0, 1, 1], [], []>} : vector<16x32xf32>, vector<32x16xf32>, vector<16x16xf32> -> vector<16x16xf32>
    %155 = vector.broadcast %12 : vector<1x16xf32> to vector<16x16xf32>
    %156 = arith.addf %154, %155 : vector<16x16xf32>
    %cst_51 = arith.constant 0.000000e+00 : f32
    %157 = vector.broadcast %cst_51 : f32 to vector<16x16xf32>
    %158 = arith.maximumf %156, %157 : vector<16x16xf32>
    %cst_52 = arith.constant dense<0.000000e+00> : vector<16x32xf32>
    %159 = tpu.matmul %158, %4, %cst_52 {dimension_numbers = #tpu.dot_dimension_numbers<[1], [0], [0], [1], [0, 0, 1, 1], [], []>} : vector<16x16xf32>, vector<16x32xf32>, vector<16x32xf32> -> vector<16x32xf32>
    %160 = arith.addf %131, %159 : vector<16x32xf32>
    %161 = vector.broadcast %10 : vector<1x32xf32> to vector<16x32xf32>
    %162 = arith.addf %160, %161 : vector<16x32xf32>
    %c0_53 = arith.constant 0 : index
    %c0_54 = arith.constant 0 : index
    %163 = vector.load %arg2[%c0_53, %c0_54] : memref<16x32xf32, #tpu.memory_space<vmem>>, vector<16x32xf32>
    tpu.vector_store %arg2[%c0_53, %c0_54], %162 {strides = array<i32>} : memref<16x32xf32, #tpu.memory_space<vmem>>, vector<16x32xf32>,
    return
  }
}

</mosaic_0001>

<bundles_post_ra>
// kernel: residual_attention_block.1
= control target key start
LH: loop header
LB: loop body
LE: loop exit
PB: predicated region body
PF: predicated region fallthrough
CT: control target
= control target key end

     0   :  { %7 = vsyncpa [#allocation3], 0  ;;  %s2109_s0 = inlined_call_operand.hbm [shape: f32[16,32], index: 0, kind: input, shape index: {}]   ;;  %s2110_s1 = inlined_call_operand.hbm [shape: f32[128,128], index: 1, kind: input, shape index: {}]   ;;  %s2111_s2 = inlined_call_operand.hbm [shape: f32[16,32], index: 2, kind: output, shape index: {}]  }
   0x1   :  { %8 = vsyncpa [#allocation6], 0 }
   0x2   :  { %9 = vsyncpa [#allocation4], 0  ;;  %s1910_s9 = smov [#allocation2]  }
   0x3   :  { %s15_s10 = sshll.u32 %s1910_s9, 4  ;;  %s16_s10 = int_to_ptr.vmem [resolvable:$true] %s15_s10 }
   0x4   :  { %s1852_s11 = scalar_lea.vmem %s16_s10, 256  ;;  %p1857_p1 = scmp.lt.s32.totalorder %s16_s10, %s16_s10 }
   0x5   :  { %p1853_p0 = scmp.ne.s32.totalorder %s16_s10, %s1852_s11  ;;  %p1858_p2 = scmp.lt.s32.totalorder %s1852_s11, %s1852_s11 }
   0x7   :  { %p1859_p3 = por %p1858_p2, %p1857_p1 }
   0x9   :  { %p1860_p4 = pnand %p1859_p3, %p1853_p0 }
   0xb   :  { %1863 = shalt.err (!%p1860_p4)
}
   0xc   :  { %s1911_s12 = smov 128   ;;  %s1912_s13 = smov 8  }
   0xd   :  { %21 = dma.hbm_to_vmem [thread:$0]  %s2109_s0, 256, %s16_s10, [#allocation3], %s1911_s12, %s1911_s12, %s1912_s13  }
   0xe   :  { %s1913_s16 = smov [#allocation5]  }
   0xf   :  { %s27_s17 = sshll.u32 %s1913_s16, 4  ;;  %s28_s17 = int_to_ptr.vmem [resolvable:$true] %s27_s17 }
  0x10   :  { %s1872_s18 = scalar_lea.vmem %s28_s17, 2048  ;;  %p1877_p6 = scmp.lt.s32.totalorder %s28_s17, %s28_s17 }
  0x11   :  { %p1873_p5 = scmp.ne.s32.totalorder %s28_s17, %s1872_s18  ;;  %p1878_p7 = scmp.lt.s32.totalorder %s1872_s18, %s1872_s18 }
  0x13   :  { %p1879_p8 = por %p1878_p7, %p1877_p6 }
  0x15   :  { %p1880_p9 = pnand %p1879_p8, %p1873_p5 }
  0x17   :  { %1883 = shalt.err (!%p1880_p9)
}
  0x18   :  { %33 = dma.hbm_to_vmem [thread:$0]  %s2110_s1, 2048, %s28_s17, [#allocation6], %s1911_s12, %s1911_s12, %s1912_s13  }
  0x19   :  { %1904 = dma.done.wait [#allocation3], 256  }
  0x1a   :  { %1905 = vsyncadd [#allocation3], 4294967040 }
  0x1b   :  { %1906 = dma.done.wait [#allocation6], 2048  }
  0x1c   :  { %1907 = vsyncadd [#allocation6], 4294965248  ;;  %vm64_vm0 = vcmask 261120   ;;  %v1953_v0 = vld [vmem:[#allocation2] sm:$0xff]  ;;  %v1955_v1 = vld [vmem:[#allocation2 + $0x8] sm:$0xff]  ;;  %vm205_vm1 = vcmask 64512   ;;  %v189_v45 = vlaneseq }
  0x1d   :  { %v65_v2 = vsel %vm64_vm0, %v1953_v0, 0.0  ;;  %v68_v3 = vsel %vm64_vm0, %v1955_v1, 0.0  ;;  %v45_v14 = vld [vmem:[#allocation5 + $0x18] sm:$0xff]  ;;  %v44_v15 = vld [vmem:[#allocation5 + $0x10] sm:$0xff]  ;;  %v43_v16 = vld [vmem:[#allocation5 + $0x8] sm:$0xff]  ;;  %s1914_s0 = smov 96  }
  0x1e   :  { %66 = vadd.xlane.f32.xlu0 %v65_v2  ;;  %1683 = vmatprep.subr.mxu0 %v45_v14  ;;  %v42_v17 = vld [vmem:[#allocation5] sm:$0xff]  ;;  %v1577_v25 = vld [vmem:[#allocation5 + $0x70] ss:$0 sm:$0xff]  ;;  %v1578_v27 = vld [vmem:[#allocation5 + $0x71] ss:$0 sm:$0xff]  ;;  %s1915_s1 = smov 120  }
  0x1f   :  { %1684 = vmatpush3.msra.mxu0 %v45_v14  ;;  %v1579_v34 = vld [vmem:[#allocation5 + $0x76] ss:$0 sm:$0xff]  ;;  %s1916_s21 = smov 88   ;;  %v190_v46 = vshrl.u32 %v189_v45, 7  ;;  %v193_v48 = vand.u32 127, %v189_v45  ;;  %vm291_vm3 = vcmask 130048  }
  0x20   :  { %1685 = vmatprep.subr.mxu0 %v44_v15  ;;  %s1917_s22 = smov 64   ;;  %s1918_s23 = smov 56  }
  0x21   :  { %1686 = vmatpush3.msra.mxu0 %v44_v15  ;;  %v191_v47 = vadd.s32 8, %v190_v46  ;;  %v196_v50 = vand.u32 1, %v193_v48  ;;  %v194_v51 = vand.u32 1, %v190_v46  ;;  %s1919_s24 = smov 80   ;;  %s1920_s25 = smov 112  }
  0x22   :  { %69 = vadd.xlane.f32.xlu0 %v68_v3  ;;  %1687 = vmatprep.subr.mxu0 %v43_v16  ;;  %s1921_s26 = smov 72   ;;  %s1922_s27 = smov 104  }
  0x23   :  { %1688 = vmatpush3.msra.mxu0 %v43_v16  ;;  %v195_v49 = vand.u32 1, %v191_v47  ;;  %vm1995_vm4 = vcmp.eq.s32.totalorder %v194_v51, %v196_v50  ;;  %s1923_s28 = smov 48   ;;  %s1924_s29 = smov 40  }
  0x24   :  { %1689 = vmatprep.subr.mxu0 %v42_v17  ;;  %s1925_s30 = smov [#allocation7]  }
  0x25   :  { %1690 = vmatpush3.msra.mxu0 %v42_v17  ;;  %vm1991_vm2 = vcmp.eq.s32.totalorder %v195_v49, %v196_v50  ;;  %s1564_s3 = sshll.u32 %s1925_s30, 4  ;;  %s1565_s3 = int_to_ptr.vmem [resolvable:$true] %s1564_s3 }
  0x26   :  { %s1884_s4 = scalar_lea.vmem %s1565_s3, 256  ;;  %p1889_p11 = scmp.lt.s32.totalorder %s1565_s3, %s1565_s3 }
  0x27   :  { %p1885_p10 = scmp.ne.s32.totalorder %s1565_s3, %s1884_s4  ;;  %p1890_p12 = scmp.lt.s32.totalorder %s1884_s4, %s1884_s4 }
  0x29   :  { %p1891_p13 = por %p1890_p12, %p1889_p11 }
  0x2b   :  { %p1892_p0 = pnand %p1891_p13, %p1885_p10 }
  0xa7   :  { %v67_v4 = vpop.xlane.xlu0 %66 }
  0xa8   :  { %v72_v5 = vmul.f32 0.03125, %v67_v4 }
  0xaa   :  { %v74_v6 = vsub.f32 %v1953_v0, %v72_v5 }
  0xab   :  { %v70_v7 = vpop.xlane.xlu0 %69 }
  0xac   :  { %v73_v8 = vmul.f32 0.03125, %v70_v7  ;;  %v76_v9 = vmul.f32 %v74_v6, %v74_v6 }
  0xae   :  { %v75_v10 = vsub.f32 %v1955_v1, %v73_v8  ;;  %v78_v11 = vsel %vm64_vm0, %v76_v9, 0.0 }
  0xaf   :  { %79 = vadd.xlane.f32.xlu1 %v78_v11 }
  0xb0   :  { %v77_v12 = vmul.f32 %v75_v10, %v75_v10 }
  0xb2   :  { %v81_v13 = vsel %vm64_vm0, %v77_v12, 0.0 }
  0xb3   :  { %82 = vadd.xlane.f32.xlu1 %v81_v13 }
 0x138   :  { %v80_v18 = vpop.xlane.xlu1 %79 }
 0x139   :  { %v84_v19 = vmul.f32 0.03125, %v80_v18 }
 0x13b   :  { %v86_v20 = vadd.f32 1e-05, %v84_v19 }
 0x13c   :  { %v83_v21 = vpop.xlane.xlu1 %82 }
 0x13d   :  { %1804 = vrsqrt.f32 %v86_v20  ;;  %v85_v22 = vmul.f32 0.03125, %v83_v21 }
 0x13f   :  { %v87_v23 = vadd.f32 1e-05, %v85_v22 }
 0x141   :  { %1806 = vrsqrt.f32 %v87_v23 }
 0x14a   :  { %v1805_v24 = vpop.eup %1804 }
 0x14b   :  { %v90_v26 = vmul.f32 %v1805_v24, %v74_v6 }
 0x14d   :  { %v96_v28 = vmul.f32 %v1577_v25, %v90_v26 }
 0x14e   :  { %v1807_v29 = vpop.eup %1806 }
 0x14f   :  { %v91_v30 = vmul.f32 %v1807_v29, %v75_v10  ;;  %v102_v31 = vadd.f32 %v1578_v27, %v96_v28 }
 0x151   :  { %v97_v32 = vmul.f32 %v1577_v25, %v91_v30  ;;  %1691 = vmatprep.mubr.msk.f32.mxu0 %vm64_vm0, %v102_v31 }
 0x153   :  { %v103_v33 = vadd.f32 %v1578_v27, %v97_v32 }
 0x155   :  { %1692 = vmatmul.mubr.msk.f32.vlgmr.msra.gmra.mxu0 %vm64_vm0, %v103_v33 }
 0x215   :  { %v1693_v35 = vpop.f32.mrf.mxu0 }
 0x216   :  { %v1967_v36 = vadd.f32 %v1693_v35, %v1579_v34 }
 0x217   :  { %v180_v37 = vpop.f32.mrf.mxu0 }
 0x218   :  { %v1969_v38 = vadd.f32 %v1579_v34, %v180_v37  ;;  %203 = vrot.lane.b32.xlu0 %v1967_v36, %s1914_s0 }
 0x21a   :  { %201 = vrot.lane.b32.xlu1 %v1969_v38, %s1914_s0  ;;  %1698 = vmatprep.mubr.msk.f32.mxu1 %vm205_vm1, %v1969_v38 }
 0x21c   :  { %401 = vrot.lane.b32.xlu0 %v1969_v38, %s1915_s1 }
 0x21e   :  { %407 = vrot.lane.b32.xlu1 %v1967_v36, %s1916_s21 }
 0x222   :  { %405 = vrot.lane.b32.xlu1 %v1969_v38, %s1916_s21 }
 0x226   :  { %403 = vrot.lane.b32.xlu1 %v1967_v36, %s1915_s1 }
 0x28a   :  { %v204_v39 = vpop.permute.xlu0 %203 }
 0x28b   :  { %1694 = vmatprep.subr.msk.mxu1 %vm205_vm1, %v204_v39 }
 0x28c   :  { %1695 = vmatpush3.xpose.msk.msra.mxu1 %vm205_vm1, %v204_v39  ;;  %v202_v40 = vpop.permute.xlu1 %201 }
 0x28d   :  { %1696 = vmatprep.subr.msk.mxu1 %vm205_vm1, %v202_v40 }
 0x28e   :  { %v402_v42 = vpop.permute.xlu0 %401 }
 0x290   :  { %1697 = vmatpush3.xpose.msk.msra.mxu1 %vm205_vm1, %v202_v40  ;;  %v408_v41 = vpop.permute.xlu1 %407  ;;  %v47_v40 = vld [vmem:[#allocation5 + $0x28] sm:$0xff] }
 0x291   :  { %1708 = vmatprep.subr.msk.mxu1 %vm205_vm1, %v408_v41 }
 0x293   :  { %1699 = vmatmul.mubr.msk.f32.vlgmr.msra.gmra.mxu1 %vm205_vm1, %v1967_v36 }
 0x294   :  { %v406_v43 = vpop.permute.xlu1 %405  ;;  %1709 = vmatpush3.xpose.msk.msra.mxu1 %vm205_vm1, %v408_v41  ;;  %1712 = vmatprep.mubr.msk.f32.mxu1 %vm205_vm1, %v402_v42 }
 0x295   :  { %1710 = vmatprep.subr.msk.mxu1 %vm205_vm1, %v406_v43 }
 0x298   :  { %1711 = vmatpush3.xpose.msk.msra.mxu1 %vm205_vm1, %v406_v43  ;;  %v404_v44 = vpop.permute.xlu1 %403 }
 0x29b   :  { %1713 = vmatmul.mubr.msk.f32.vlgmr.msra.gmra.mxu1 %vm205_vm1, %v404_v44  ;;  %v46_v44 = vld [vmem:[#allocation5 + $0x20] sm:$0xff] }
 0x29c   :  { %1727 = vmatprep.subr.mxu1 %v46_v44 }
 0x29d   :  { %1728 = vmatpush3.msra.mxu1 %v46_v44 }
 0x353   :  { %v1700_v53 = vpop.f32.mrf.mxu1 }
 0x354   :  { %v290_v55 = vsel %vm1991_vm2, %v1700_v53, -1e+30 }
 0x355   :  { %v280_v56 = vpop.f32.mrf.mxu1  ;;  %v295_v57 = vsel %vm291_vm3, %v290_v55, -inf }
 0x356   :  { %v289_v58 = vsel %vm1995_vm4, %v280_v56, -1e+30  ;;  %296 = vmax.xlane.f32.xlu1 %v295_v57 }
 0x357   :  { %v292_v59 = vsel %vm291_vm3, %v289_v58, -inf }
 0x358   :  { %293 = vmax.xlane.f32.xlu0 %v292_v59 }
 0x35b   :  { %v1714_v60 = vpop.f32.mrf.mxu1 }
 0x35c   :  { %v493_v2 = vsel %vm1991_vm2, %v1714_v60, -1e+30 }
 0x35d   :  { %v483_v61 = vpop.f32.mrf.mxu1  ;;  %v497_v3 = vsel %vm291_vm3, %v493_v2, -inf }
 0x35e   :  { %v492_v62 = vsel %vm1995_vm4, %v483_v61, -1e+30 }
 0x35f   :  { %v494_v63 = vsel %vm291_vm3, %v492_v62, -inf }
 0x360   :  { %495 = vmax.xlane.f32.xlu0 %v494_v63 }
 0x364   :  { %498 = vmax.xlane.f32.xlu0 %v497_v3 }
 0x3df   :  { %v297_v4 = vpop.xlane.xlu1 %296 }
 0x3e0   :  { %v299_v5 = vsub.f32 %v290_v55, %v297_v4 }
 0x3e1   :  { %v294_v6 = vpop.xlane.xlu0 %293 }
 0x3e2   :  { %v302_v7 = vmul.f32 1.442695, %v299_v5  ;;  %v298_v8 = vsub.f32 %v289_v58, %v294_v6 }
 0x3e4   :  { %1808 = vpow2.f32 %v302_v7  ;;  %v300_v9 = vmul.f32 1.442695, %v298_v8 }
 0x3e6   :  { %1810 = vpow2.f32 %v300_v9 }
 0x3e9   :  { %v496_v10 = vpop.xlane.xlu0 %495 }
 0x3ea   :  { %v500_v11 = vsub.f32 %v492_v62, %v496_v10 }
 0x3ec   :  { %v502_v12 = vmul.f32 1.442695, %v500_v11 }
 0x3ed   :  { %v499_v13 = vpop.xlane.xlu0 %498 }
 0x3ee   :  { %1812 = vpow2.f32 %v502_v12  ;;  %v501_v14 = vsub.f32 %v493_v2, %v499_v13 }
 0x3f0   :  { %v504_v15 = vmul.f32 1.442695, %v501_v14 }
 0x3f1   :  { %v1809_v16 = vpop.eup %1808 }
 0x3f2   :  { %1814 = vpow2.f32 %v504_v15  ;;  %v307_v17 = vsel %vm291_vm3, %v1809_v16, 0.0 }
 0x3f3   :  { %v1811_v18 = vpop.eup %1810  ;;  %308 = vadd.xlane.f32.xlu1 %v307_v17 }
 0x3f4   :  { %v304_v19 = vsel %vm291_vm3, %v1811_v18, 0.0 }
 0x3f5   :  { %305 = vadd.xlane.f32.xlu0 %v304_v19 }
 0x3fb   :  { %v1813_v20 = vpop.eup %1812 }
 0x3fc   :  { %v506_v21 = vsel %vm291_vm3, %v1813_v20, 0.0 }
 0x3fd   :  { %507 = vadd.xlane.f32.xlu0 %v506_v21 }
 0x3ff   :  { %v1815_v22 = vpop.eup %1814 }
 0x400   :  { %v509_v23 = vsel %vm291_vm3, %v1815_v22, 0.0 }
 0x401   :  { %510 = vadd.xlane.f32.xlu1 %v509_v23 }
 0x412   :  { %314 = vrot.lane.b32.xlu1 %v1969_v38, %s1917_s22 }
 0x413   :  { %316 = vrot.lane.b32.xlu0 %v1967_v36, %s1917_s22 }
 0x416   :  { %518 = vrot.lane.b32.xlu1 %v1967_v36, %s1918_s23 }
 0x417   :  { %771 = vrot.lane.b32.xlu0 %v1967_v36, %s1919_s24 }
 0x41a   :  { %516 = vrot.lane.b32.xlu1 %v1969_v38, %s1918_s23 }
 0x41b   :  { %765 = vrot.lane.b32.xlu0 %v1969_v38, %s1920_s25 }
 0x41e   :  { %769 = vrot.lane.b32.xlu1 %v1969_v38, %s1919_s24 }
 0x41f   :  { %1056 = vrot.lane.b32.xlu0 %v1967_v36, %s1921_s26 }
 0x422   :  { %767 = vrot.lane.b32.xlu1 %v1967_v36, %s1920_s25 }
 0x423   :  { %1050 = vrot.lane.b32.xlu0 %v1969_v38, %s1922_s27 }
 0x426   :  { %1054 = vrot.lane.b32.xlu1 %v1969_v38, %s1921_s26 }
 0x42a   :  { %1052 = vrot.lane.b32.xlu1 %v1967_v36, %s1922_s27 }
 0x47c   :  { %v309_v24 = vpop.xlane.xlu1 %308 }
 0x47d   :  { %1816 = vrcp.f32 %v309_v24 }
 0x47e   :  { %v306_v25 = vpop.xlane.xlu0 %305 }
 0x47f   :  { %1818 = vrcp.f32 %v306_v25 }
 0x486   :  { %v508_v26 = vpop.xlane.xlu0 %507 }
 0x487   :  { %1820 = vrcp.f32 %v508_v26 }
 0x48a   :  { %v511_v27 = vpop.xlane.xlu1 %510  ;;  %v317_v28 = vpop.permute.xlu0 %316 }
 0x48b   :  { %v1817_v29 = vpop.eup %1816  ;;  %1822 = vrcp.f32 %v511_v27  ;;  %1701 = vmatprep.subr.mxu0 %v317_v28 }
 0x48c   :  { %v1819_v30 = vpop.eup %1818  ;;  %1702 = vmatpush3.msra.mxu0 %v317_v28  ;;  %v313_v33 = vmul.f32 %v1817_v29, %v1809_v16 }
 0x48d   :  { %v312_v31 = vmul.f32 %v1819_v30, %v1811_v18  ;;  %v48_v30 = vld [vmem:[#allocation5 + $0x30] sm:$0xff] }
 0x48e   :  { %v315_v32 = vpop.permute.xlu1 %314  ;;  %v772_v43 = vpop.permute.xlu0 %771 }
 0x48f   :  { %1703 = vmatprep.subr.mxu0 %v315_v32  ;;  %1705 = vmatprep.mubr.msk.f32.mxu0 %vm291_vm3, %v312_v31 }
 0x490   :  { %1704 = vmatpush3.msra.mxu0 %v315_v32 }
 0x491   :  { %1706 = vmatmul.mubr.msk.f32.vlgmr.msra.gmra.mxu0 %vm291_vm3, %v313_v33 }
 0x492   :  { %v519_v34 = vpop.permute.xlu1 %518  ;;  %v766_v47 = vpop.permute.xlu0 %765 }
 0x493   :  { %1715 = vmatprep.subr.mxu0 %v519_v34 }
 0x494   :  { %v1821_v35 = vpop.eup %1820  ;;  %1716 = vmatpush3.msra.mxu0 %v519_v34 }
 0x495   :  { %v514_v37 = vmul.f32 %v1821_v35, %v1813_v20 }
 0x496   :  { %v517_v39 = vpop.permute.xlu1 %516  ;;  %v1057_v51 = vpop.permute.xlu0 %1056 }
 0x497   :  { %1717 = vmatprep.subr.mxu0 %v517_v39  ;;  %1719 = vmatprep.mubr.msk.f32.mxu0 %vm291_vm3, %v514_v37 }
 0x498   :  { %v1823_v41 = vpop.eup %1822  ;;  %1718 = vmatpush3.msra.mxu0 %v517_v39 }
 0x499   :  { %1722 = vmatprep.subr.mxu0 %v47_v40  ;;  %v515_v42 = vmul.f32 %v1823_v41, %v1815_v22 }
 0x49a   :  { %v770_v49 = vpop.permute.xlu1 %769  ;;  %v1051_v55 = vpop.permute.xlu0 %1050 }
 0x49b   :  { %1720 = vmatmul.mubr.msk.f32.vlgmr.msra.gmra.mxu0 %vm291_vm3, %v515_v42 }
 0x49c   :  { %1723 = vmatpush3.msra.mxu0 %v47_v40 }
 0x49d   :  { %1732 = vmatprep.subr.msk.mxu0 %vm205_vm1, %v772_v43 }
 0x49e   :  { %v768_v53 = vpop.permute.xlu1 %767 }
 0x4a2   :  { %v1055_v56 = vpop.permute.xlu1 %1054 }
 0x4a6   :  { %v1053_v57 = vpop.permute.xlu1 %1052 }
 0x551   :  { %v1707_v45 = vpop.f32.mrf.mxu0 }
 0x553   :  { %v392_v46 = vpop.f32.mrf.mxu0 }
 0x554   :  { %1729 = vmatprep.mubr.msk.f32.mxu1 %vm205_vm1, %v392_v46 }
 0x555   :  { %1730 = vmatmul.mubr.msk.f32.vlgmr.msra.gmra.mxu1 %vm205_vm1, %v1707_v45 }
 0x55b   :  { %v1721_v48 = vpop.f32.mrf.mxu0 }
 0x55d   :  { %v594_v50 = vpop.f32.mrf.mxu0 }
 0x55e   :  { %1724 = vmatprep.mubr.msk.f32.mxu0 %vm205_vm1, %v594_v50  ;;  %v49_v50 = vld [vmem:[#allocation5 + $0x38] sm:$0xff] }
 0x55f   :  { %1725 = vmatmul.mubr.msk.f32.vlgmr.msra.gmra.mxu0 %vm205_vm1, %v1721_v48 }
 0x560   :  { %1733 = vmatpush3.xpose.msk.msra.mxu0 %vm205_vm1, %v772_v43  ;;  %1736 = vmatprep.mubr.msk.f32.mxu0 %vm205_vm1, %v766_v47 }
 0x561   :  { %1734 = vmatprep.subr.msk.mxu0 %vm205_vm1, %v770_v49 }
 0x564   :  { %1735 = vmatpush3.xpose.msk.msra.mxu0 %vm205_vm1, %v770_v49 }
 0x565   :  { %1751 = vmatprep.subr.msk.mxu0 %vm205_vm1, %v1057_v51 }
 0x567   :  { %1737 = vmatmul.mubr.msk.f32.vlgmr.msra.gmra.mxu0 %vm205_vm1, %v768_v53 }
 0x568   :  { %1752 = vmatpush3.xpose.msk.msra.mxu0 %vm205_vm1, %v1057_v51  ;;  %1755 = vmatprep.mubr.msk.f32.mxu0 %vm205_vm1, %v1051_v55 }
 0x569   :  { %1753 = vmatprep.subr.msk.mxu0 %vm205_vm1, %v1055_v56 }
 0x56c   :  { %1754 = vmatpush3.xpose.msk.msra.mxu0 %vm205_vm1, %v1055_v56 }
 0x56f   :  { %1756 = vmatmul.mubr.msk.f32.vlgmr.msra.gmra.mxu0 %vm205_vm1, %v1053_v57 }
 0x615   :  { %v1731_v58 = vpop.f32.mrf.mxu1 }
 0x617   :  { %v756_v42 = vpop.f32.mrf.mxu1 }
 0x61f   :  { %v1726_v59 = vpop.f32.mrf.mxu0 }
 0x620   :  { %v2047_v60 = vadd.f32 %v1731_v58, %v1726_v59 }
 0x621   :  { %v2049_v61 = vpop.f32.mrf.mxu0 }
 0x622   :  { %v757_v53 = vadd.f32 %v756_v42, %v2049_v61 }
 0x627   :  { %v1738_v62 = vpop.f32.mrf.mxu0 }
 0x628   :  { %v857_v63 = vsel %vm1991_vm2, %v1738_v62, -1e+30 }
 0x629   :  { %v847_v2 = vpop.f32.mrf.mxu0  ;;  %v861_v3 = vsel %vm291_vm3, %v857_v63, -inf }
 0x62a   :  { %v856_v4 = vsel %vm1995_vm4, %v847_v2, -1e+30  ;;  %862 = vmax.xlane.f32.xlu1 %v861_v3  ;;  %v1614_v2 = vld [vmem:[#allocation5 + $0x74] ss:$0 sm:$0xff] }
 0x62b   :  { %v858_v5 = vsel %vm291_vm3, %v856_v4, -inf }
 0x62c   :  { %859 = vmax.xlane.f32.xlu0 %v858_v5 }
 0x62f   :  { %v1757_v6 = vpop.f32.mrf.mxu0 }
 0x630   :  { %v1142_v23 = vsel %vm1991_vm2, %v1757_v6, -1e+30 }
 0x631   :  { %v1132_v7 = vpop.f32.mrf.mxu0  ;;  %v1146_v24 = vsel %vm291_vm3, %v1142_v23, -inf }
 0x632   :  { %v1141_v8 = vsel %vm1995_vm4, %v1132_v7, -1e+30 }
 0x633   :  { %v1143_v9 = vsel %vm291_vm3, %v1141_v8, -inf }
 0x63b   :  { %880 = vrot.lane.b32.xlu1 %v1969_v38, %s1923_s28 }
 0x65f   :  { %1144 = vmax.xlane.f32.xlu1 %v1143_v9 }
 0x6b3   :  { %v863_v10 = vpop.xlane.xlu1 %862 }
 0x6b4   :  { %v865_v11 = vsub.f32 %v857_v63, %v863_v10 }
 0x6b5   :  { %v860_v12 = vpop.xlane.xlu0 %859 }
 0x6b6   :  { %v868_v13 = vmul.f32 1.442695, %v865_v11  ;;  %v864_v14 = vsub.f32 %v856_v4, %v860_v12 }
 0x6b7   :  { %v881_v54 = vpop.permute.xlu1 %880 }
 0x6b8   :  { %1824 = vpow2.f32 %v868_v13  ;;  %v866_v15 = vmul.f32 1.442695, %v864_v14 }
 0x6ba   :  { %1826 = vpow2.f32 %v866_v15 }
 0x6c5   :  { %v1825_v16 = vpop.eup %1824 }
 0x6c6   :  { %v873_v17 = vsel %vm291_vm3, %v1825_v16, 0.0 }
 0x6c7   :  { %v1827_v18 = vpop.eup %1826  ;;  %874 = vadd.xlane.f32.xlu0 %v873_v17  ;;  %v53_v17 = vld [vmem:[#allocation5 + $0x58] sm:$0xff] }
 0x6c8   :  { %v870_v19 = vsel %vm291_vm3, %v1827_v18, 0.0  ;;  %1770 = vmatprep.subr.mxu0 %v53_v17 }
 0x6c9   :  { %1771 = vmatpush3.msra.mxu0 %v53_v17 }
 0x6cb   :  { %871 = vadd.xlane.f32.xlu0 %v870_v19  ;;  %v51_v19 = vld [vmem:[#allocation5 + $0x48] sm:$0xff] }
 0x6e1   :  { %882 = vrot.lane.b32.xlu0 %v1967_v36, %s1923_s28 }
 0x6e8   :  { %v1145_v20 = vpop.xlane.xlu1 %1144 }
 0x6e9   :  { %v1149_v21 = vsub.f32 %v1141_v8, %v1145_v20 }
 0x6eb   :  { %v1151_v22 = vmul.f32 1.442695, %v1149_v21 }
 0x6ed   :  { %1828 = vpow2.f32 %v1151_v22 }
 0x6fa   :  { %v1829_v25 = vpop.eup %1828 }
 0x6fb   :  { %v1155_v26 = vsel %vm291_vm3, %v1829_v25, 0.0 }
 0x700   :  { %1147 = vmax.xlane.f32.xlu0 %v1146_v24 }
 0x704   :  { %1156 = vadd.xlane.f32.xlu0 %v1155_v26 }
 0x71a   :  { %1167 = vrot.lane.b32.xlu0 %v1967_v36, %s1924_s29 }
 0x750   :  { %v875_v27 = vpop.xlane.xlu0 %874 }
 0x751   :  { %1830 = vrcp.f32 %v875_v27  ;;  %v1615_v27 = vld [vmem:[#allocation5 + $0x72] ss:$0 sm:$0xff] }
 0x754   :  { %v872_v28 = vpop.xlane.xlu0 %871 }
 0x755   :  { %1832 = vrcp.f32 %v872_v28 }
 0x758   :  { %v883_v29 = vpop.permute.xlu0 %882 }
 0x759   :  { %1739 = vmatprep.subr.mxu1 %v883_v29 }
 0x75a   :  { %1740 = vmatpush3.msra.mxu1 %v883_v29 }
 0x75b   :  { %1741 = vmatprep.subr.mxu1 %v881_v54 }
 0x75c   :  { %1742 = vmatpush3.msra.mxu1 %v881_v54  ;;  %v50_v54 = vld [vmem:[#allocation5 + $0x40] sm:$0xff] }
 0x75d   :  { %1746 = vmatprep.subr.mxu1 %v48_v30 }
 0x75e   :  { %v1831_v52 = vpop.eup %1830 }
 0x75f   :  { %v879_v33 = vmul.f32 %v1831_v52, %v1825_v16 }
 0x762   :  { %v1833_v31 = vpop.eup %1832 }
 0x763   :  { %v878_v32 = vmul.f32 %v1833_v31, %v1827_v18  ;;  %v52_v18 = vld [vmem:[#allocation5 + $0x50] sm:$0xff] }
 0x764   :  { %1772 = vmatprep.subr.mxu0 %v52_v18  ;;  %v1616_v31 = vld [vmem:[#allocation5 + $0x73] ss:$0 sm:$0xff] }
 0x765   :  { %1743 = vmatprep.mubr.msk.f32.mxu1 %vm291_vm3, %v878_v32  ;;  %1773 = vmatpush3.msra.mxu0 %v52_v18 }
 0x766   :  { %1744 = vmatmul.mubr.msk.f32.vlgmr.msra.gmra.mxu1 %vm291_vm3, %v879_v33  ;;  %1774 = vmatprep.subr.mxu0 %v51_v19 }
 0x767   :  { %1747 = vmatpush3.msra.mxu1 %v48_v30  ;;  %1775 = vmatpush3.msra.mxu0 %v51_v19 }
 0x768   :  { %1776 = vmatprep.subr.mxu0 %v50_v54 }
 0x769   :  { %1777 = vmatpush3.msra.mxu0 %v50_v54 }
 0x789   :  { %v1148_v36 = vpop.xlane.xlu0 %1147 }
 0x78a   :  { %v1150_v34 = vsub.f32 %v1142_v23, %v1148_v36 }
 0x78c   :  { %v1153_v35 = vmul.f32 1.442695, %v1150_v34  ;;  %v55_v34 = vld [vmem:[#allocation5 + $0x68] sm:$0xff] }
 0x78d   :  { %v1157_v37 = vpop.xlane.xlu0 %1156 }
 0x78e   :  { %1834 = vpow2.f32 %v1153_v35  ;;  %v54_v35 = vld [vmem:[#allocation5 + $0x60] sm:$0xff] }
 0x78f   :  { %1836 = vrcp.f32 %v1157_v37  ;;  %v1617_v37 = vld [vmem:[#allocation5 + $0x77] ss:$0 sm:$0xff] }
 0x791   :  { %v1168_v39 = vpop.permute.xlu0 %1167 }
 0x792   :  { %1758 = vmatprep.subr.mxu1 %v1168_v39 }
 0x79b   :  { %v1835_v40 = vpop.eup %1834 }
 0x79c   :  { %v1158_v41 = vsel %vm291_vm3, %v1835_v40, 0.0  ;;  %v1837_v43 = vpop.eup %1836 }
 0x79d   :  { %1159 = vadd.xlane.f32.xlu1 %v1158_v41  ;;  %v1163_v47 = vmul.f32 %v1837_v43, %v1829_v25 }
 0x7ae   :  { %1165 = vrot.lane.b32.xlu1 %v1969_v38, %s1924_s29 }
 0x826   :  { %v1745_v44 = vpop.f32.mrf.mxu1  ;;  %v1160_v45 = vpop.xlane.xlu1 %1159 }
 0x827   :  { %1838 = vrcp.f32 %v1160_v45  ;;  %v1622_v45 = vld [vmem:[#allocation5 + $0x75] ss:$0 sm:$0xff] }
 0x828   :  { %v958_v46 = vpop.f32.mrf.mxu1 }
 0x829   :  { %1748 = vmatprep.mubr.msk.f32.mxu1 %vm205_vm1, %v958_v46 }
 0x82a   :  { %1749 = vmatmul.mubr.msk.f32.vlgmr.msra.gmra.mxu1 %vm205_vm1, %v1745_v44  ;;  %v1166_v48 = vpop.permute.xlu1 %1165 }
 0x82b   :  { %1759 = vmatpush3.msra.mxu1 %v1168_v39  ;;  %1762 = vmatprep.mubr.msk.f32.mxu1 %vm291_vm3, %v1163_v47 }
 0x82c   :  { %1760 = vmatprep.subr.mxu1 %v1166_v48 }
 0x82d   :  { %1761 = vmatpush3.msra.mxu1 %v1166_v48 }
 0x82e   :  { %1765 = vmatprep.subr.mxu1 %v49_v50 }
 0x834   :  { %v1839_v49 = vpop.eup %1838 }
 0x835   :  { %v1164_v38 = vmul.f32 %v1839_v49, %v1835_v40 }
 0x837   :  { %1763 = vmatmul.mubr.msk.f32.vlgmr.msra.gmra.mxu1 %vm291_vm3, %v1164_v38 }
 0x838   :  { %1766 = vmatpush3.msra.mxu1 %v49_v50 }
 0x839   :  { %1781 = vmatprep.subr.mxu1 %v55_v34 }
 0x8ea   :  { %v1750_v51 = vpop.f32.mrf.mxu1 }
 0x8eb   :  { %v1049_v55 = vadd.f32 %v1750_v51, %v2047_v60 }
 0x8ec   :  { %v1039_v56 = vpop.f32.mrf.mxu1 }
 0x8ed   :  { %v1048_v57 = vadd.f32 %v1039_v56, %v757_v53 }
 0x8f7   :  { %v1764_v58 = vpop.f32.mrf.mxu1 }
 0x8f9   :  { %v1243_v59 = vpop.f32.mrf.mxu1 }
 0x8fa   :  { %1767 = vmatprep.mubr.msk.f32.mxu1 %vm205_vm1, %v1243_v59 }
 0x8fb   :  { %1768 = vmatmul.mubr.msk.f32.vlgmr.msra.gmra.mxu1 %vm205_vm1, %v1764_v58 }
 0x8fc   :  { %1782 = vmatpush3.msra.mxu1 %v55_v34 }
 0x8fd   :  { %1783 = vmatprep.subr.mxu1 %v54_v35 }
 0x8fe   :  { %1784 = vmatpush3.msra.mxu1 %v54_v35 }
 0x9bb   :  { %v1769_v62 = vpop.f32.mrf.mxu1 }
 0x9bc   :  { %v1334_v63 = vadd.f32 %v1769_v62, %v1049_v55 }
 0x9bd   :  { %v1324_v3 = vpop.f32.mrf.mxu1 }
 0x9be   :  { %v1336_v4 = vadd.f32 %v1334_v63, %v1955_v1  ;;  %v1333_v5 = vadd.f32 %v1324_v3, %v1048_v57 }
 0x9c0   :  { %v2082_v6 = vadd.f32 %v1614_v2, %v1336_v4  ;;  %v1335_v61 = vadd.f32 %v1333_v5, %v1953_v0 }
 0x9c2   :  { %v2085_v60 = vadd.f32 %v1614_v2, %v1335_v61  ;;  %v1346_v7 = vsel %vm64_vm0, %v2082_v6, 0.0 }
 0x9c3   :  { %1347 = vadd.xlane.f32.xlu0 %v1346_v7 }
 0x9c4   :  { %v1343_v8 = vsel %vm64_vm0, %v2085_v60, 0.0 }
 0x9c5   :  { %1344 = vadd.xlane.f32.xlu1 %v1343_v8 }
 0xa4c   :  { %v1348_v9 = vpop.xlane.xlu0 %1347 }
 0xa4d   :  { %v1350_v10 = vmul.f32 0.03125, %v1348_v9 }
 0xa4e   :  { %v1345_v11 = vpop.xlane.xlu1 %1344 }
 0xa4f   :  { %v1352_v1 = vsub.f32 %v2082_v6, %v1350_v10  ;;  %v1349_v12 = vmul.f32 0.03125, %v1345_v11 }
 0xa51   :  { %v1351_v13 = vsub.f32 %v2085_v60, %v1349_v12  ;;  %v1354_v14 = vmul.f32 %v1352_v1, %v1352_v1 }
 0xa53   :  { %v1358_v0 = vsel %vm64_vm0, %v1354_v14, 0.0  ;;  %v1353_v15 = vmul.f32 %v1351_v13, %v1351_v13 }
 0xa54   :  { %1359 = vadd.xlane.f32.xlu1 %v1358_v0 }
 0xa55   :  { %v1355_v16 = vsel %vm64_vm0, %v1353_v15, 0.0 }
 0xa56   :  { %1356 = vadd.xlane.f32.xlu0 %v1355_v16 }
 0xadd   :  { %v1360_v20 = vpop.xlane.xlu1 %1359 }
 0xade   :  { %v1362_v21 = vmul.f32 0.03125, %v1360_v20 }
 0xadf   :  { %v1357_v22 = vpop.xlane.xlu0 %1356 }
 0xae0   :  { %v1364_v23 = vadd.f32 1e-05, %v1362_v21  ;;  %v1361_v24 = vmul.f32 0.03125, %v1357_v22 }
 0xae2   :  { %1840 = vrsqrt.f32 %v1364_v23  ;;  %v1363_v25 = vadd.f32 1e-05, %v1361_v24 }
 0xae4   :  { %1842 = vrsqrt.f32 %v1363_v25 }
 0xaef   :  { %v1841_v26 = vpop.eup %1840 }
 0xaf0   :  { %v1368_v28 = vmul.f32 %v1841_v26, %v1352_v1 }
 0xaf1   :  { %v1843_v29 = vpop.eup %1842 }
 0xaf2   :  { %v1367_v30 = vmul.f32 %v1843_v29, %v1351_v13  ;;  %v1374_v52 = vmul.f32 %v1615_v27, %v1368_v28 }
 0xaf4   :  { %v1373_v32 = vmul.f32 %v1615_v27, %v1367_v30  ;;  %v1380_v36 = vadd.f32 %v1616_v31, %v1374_v52 }
 0xaf6   :  { %v1379_v33 = vadd.f32 %v1616_v31, %v1373_v32 }
 0xaf8   :  { %1778 = vmatprep.mubr.msk.f32.mxu0 %vm64_vm0, %v1379_v33 }
 0xaf9   :  { %1779 = vmatmul.mubr.msk.f32.vlgmr.msra.gmra.mxu0 %vm64_vm0, %v1380_v36 }
 0xbb9   :  { %v1780_v39 = vpop.f32.mrf.mxu0 }
 0xbba   :  { %v1463_v40 = vadd.f32 %v1780_v39, %v1617_v37 }
 0xbbb   :  { %v1457_v41 = vpop.f32.mrf.mxu0 }
 0xbbc   :  { %v1458_v42 = vadd.f32 %v1617_v37, %v1457_v41  ;;  %v1467_v44 = vmax.f32 %v1463_v40, 0.0 }
 0xbbe   :  { %v1466_v43 = vmax.f32 %v1458_v42, 0.0 }
 0xbc0   :  { %1785 = vmatprep.mubr.msk.f32.mxu1 %vm291_vm3, %v1466_v43 }
 0xbc1   :  { %1786 = vmatmul.mubr.msk.f32.vlgmr.msra.gmra.mxu1 %vm291_vm3, %v1467_v44 }
 0xc81   :  { %v1787_v46 = vpop.f32.mrf.mxu1 }
 0xc82   :  { %v1550_v47 = vadd.f32 %v1787_v46, %v2082_v6 }
 0xc83   :  { %v1540_v48 = vpop.f32.mrf.mxu1 }
 0xc84   :  { %v1556_v49 = vadd.f32 %v1622_v45, %v1550_v47  ;;  %v1549_v38 = vadd.f32 %v1540_v48, %v2085_v60 }
 0xc86   :  { %1558 = vst.msk [vmem:[#allocation7 + $0x8] sm:$0xff] %vm64_vm0, %v1556_v49  ;;  %v1555_v50 = vadd.f32 %v1622_v45, %v1549_v38 }
 0xc88   :  { %1557 = vst.msk [vmem:[#allocation7] sm:$0xff] %vm64_vm0, %v1555_v50 }
 0xc89   :  { %1895 = shalt.err (!%p1892_p0)
}
 0xc8a   :  { %1570 = dma.vmem_to_hbm [thread:$0]  %s1565_s3, 256, %s2111_s2, [#allocation4], %s1911_s12, %s1911_s12, %s1912_s13  }
 0xc8b   :  { %1908 = dma.done.wait [#allocation4], 256  }
 0xc8c   :  { %1909 = vsyncadd [#allocation4], 4294967040 }
 0xc8d   :  { %1574 = vsyncpa [#allocation3], 1 }
 0xc8e   :  { %1575 = vsyncpa [#allocation6], 1 }
 0xc8f   :  { %1576 = vsyncpa [#allocation4], 1 }

</bundles_post_ra>
